<compile_context>
chip_gen: v7x
topology: tpu7x:2x2x1
jax: 0.10.0
libtpu: 0.0.40
codegen_flags: <defaults>
</compile_context>

<pallas_src>
import functools

import jax
import jax.numpy as jnp
from jax import lax
from jax.experimental import pallas as pl
from jax.experimental.pallas import tpu as pltpu


def _um_loss_kernel(gt_ref, cas_ref, score_act_ref, score_bkg_ref, label_ref,
                    label_flat_ref, feat_act_ref, feat_bkg_ref, out_ref,
                    npos_acc, s1_acc, s2_acc, s3_acc,
                    *, alpha, beta, lmbd, bkg_lmbd, margin, t_true, t_tile):
    f32 = jnp.float32
    tb = pl.program_id(0)
    n_tb = pl.num_programs(0)

    # ------------- init accumulators on the first temporal block -------------
    @pl.when(tb == 0)
    def _init():
        npos_acc[...] = jnp.zeros_like(npos_acc)
        s1_acc[...] = jnp.zeros_like(s1_acc)
        s2_acc[...] = jnp.zeros_like(s2_acc)
        s3_acc[...] = jnp.zeros_like(s3_acc)

    # ------------- hot loop: lane-dense (B*C, t_tile) block, T on lanes ------
    gt_b = gt_ref[...].astype(f32)              # pre-binarized 0/1  (BC, tile)
    cas = cas_ref[...].astype(f32)              # (BC, tile)
    log_c = jnp.log(cas + 1e-5)                 # EUP
    log_1mc = jnp.log(1.0 - cas + 1e-5)         # EUP
    if t_true % t_tile != 0:
        # zero out padded temporal positions (they only leak in via log_1mc;
        # padded gt is exactly 0 already, so npos / s1 need no mask)
        t_idx = lax.broadcasted_iota(jnp.int32, cas.shape, 1) + tb * t_tile
        log_1mc = jnp.where(t_idx < t_true, log_1mc, 0.0)

    npos_acc[...] += jnp.sum(gt_b, axis=-1, keepdims=True)
    s1_acc[...] += jnp.sum(gt_b * log_c, axis=-1, keepdims=True)
    s2_acc[...] += jnp.sum((1.0 - gt_b) * log_1mc, axis=-1, keepdims=True)
    s3_acc[...] += jnp.sum(log_1mc, axis=-1, keepdims=True)

    # ------------- finalize: all scalar losses on the last block -------------
    @pl.when(tb == n_tb - 1)
    def _finalize():
        def mean_all(x):
            return jnp.sum(x, keepdims=True).reshape(1, 1) / float(x.size)

        def sum_all(x):
            return jnp.sum(x, keepdims=True).reshape(1, 1)

        score_act = score_act_ref[...].astype(f32)      # (B, C)
        score_bkg = score_bkg_ref[...].astype(f32)      # (B, C)
        label = label_ref[...].astype(f32)              # (B, C)
        C = label.shape[1]

        # --- classification / background BCE (nn.BCELoss, mean reduction) ---
        # NOTE: all-zero label rows give NaN, exactly like the PyTorch module.
        label_n = label / jnp.sum(label, axis=1, keepdims=True)

        def bce_mean(p, y):
            logp = jnp.maximum(jnp.log(p), -100.0)       # BCELoss log clamp
            log1mp = jnp.maximum(jnp.log(1.0 - p), -100.0)
            return mean_all(-(y * logp + (1.0 - y) * log1mp))

        loss_cls = bce_mean(score_act, label_n)
        loss_be = bce_mean(score_bkg, jnp.full_like(label, 1.0 / C))

        # --- uncertainty-modeling feature-magnitude loss ---------------------
        feat_act = feat_act_ref[...].astype(f32)         # (B, Tf, D)
        feat_bkg = feat_bkg_ref[...].astype(f32)
        mean_act = jnp.mean(feat_act, axis=1)            # (B, D)
        mean_bkg = jnp.mean(feat_bkg, axis=1)
        norm_act = jnp.sqrt(jnp.sum(mean_act * mean_act, axis=1, keepdims=True))
        norm_bkg = jnp.sqrt(jnp.sum(mean_bkg * mean_bkg, axis=1, keepdims=True))
        loss_um = mean_all((jnp.maximum(margin - norm_act, 0.0) + norm_bkg) ** 2)

        # --- balanced temporal BCE from the accumulated statistics ----------
        inv_T = 1.0 / float(t_true)
        npos = npos_acc[...]                              # (BC, 1)
        m1 = s1_acc[...] * inv_T                          # mean_T(gt*log c)
        m2 = s2_acc[...] * inv_T                          # mean_T((1-gt)*log(1-c))
        m3 = s3_acc[...] * inv_T                          # mean_T(log(1-c))
        r = float(t_true) / jnp.maximum(npos, 1.0)
        all_pos = npos == float(t_true)                   # r == 1 branch
        denom = jnp.where(all_pos, 1.0, r - 1.0)
        coef_0 = jnp.where(all_pos, 0.0, 0.5 * r / denom)
        coef_1 = jnp.where(all_pos, 1.0, 0.5 * r)         # coef_0*(r-1) == 0.5*r
        loss_pos = -coef_1 * m1 - coef_0 * m2
        act_col = jnp.where(npos == 0.0, -m2, loss_pos)   # (BC, 1)
        bkg_col = -m3                                     # (BC, 1)

        is_act = (label_flat_ref[...].astype(f32) > 0.0).astype(f32)  # (BC, 1)
        act_count = sum_all(is_act)
        bkg_count = sum_all(1.0 - is_act)
        # guard zero counts (original torch code would produce NaN/inf here)
        act_loss = jnp.where(
            act_count > 0.0,
            sum_all(is_act * act_col) / jnp.maximum(act_count, 1.0), 0.0)
        if bkg_lmbd > 0:
            bkg_loss = jnp.where(
                bkg_count > 0.0,
                sum_all((1.0 - is_act) * bkg_col) / jnp.maximum(bkg_count, 1.0),
                0.0)
        else:
            bkg_loss = jnp.zeros((1, 1), f32)

        loss_sup_act = lmbd * act_loss
        loss_sup_bkg = lmbd * bkg_lmbd * bkg_loss
        loss_sup = loss_sup_act + loss_sup_bkg
        loss_total = loss_cls + alpha * loss_um + beta * loss_be + loss_sup

        # lane-dense output: one scalar per row, plain row stores (no selects)
        def row(x):
            return jnp.broadcast_to(x, (1, 128))

        out_ref[...] = jnp.zeros_like(out_ref)
        out_ref[0:1, :] = row(loss_total)
        out_ref[1:2, :] = row(loss_cls)
        out_ref[2:3, :] = row(loss_be)
        out_ref[3:4, :] = row(loss_um)
        out_ref[4:5, :] = row(loss_sup_act)
        out_ref[5:6, :] = row(loss_sup_bkg)
        out_ref[6:7, :] = row(loss_sup)


def um_loss_forward(score_act, score_bkg, feat_act, feat_bkg, label, gt, cas,
                    *, alpha, beta, lmbd, bkg_lmbd, margin, thres):
    B, T, C = gt.shape
    BC = B * C
    LANE = 128
    t_tile = min(512, ((T + LANE - 1) // LANE) * LANE)
    t_pad = ((T + t_tile - 1) // t_tile) * t_tile
    n_tb = t_pad // t_tile

    # Wrapper-side layout plumbing: T onto lanes, (B,C) flattened onto
    # sublanes; gt binarized here (bf16 0/1) so the kernel streams fewer bytes.
    gt_bin = (jnp.transpose(gt, (0, 2, 1)).reshape(BC, T) > thres
              ).astype(jnp.bfloat16)
    cas_t = jnp.transpose(cas, (0, 2, 1)).reshape(BC, T).astype(jnp.float32)
    if t_pad != T:
        gt_bin = jnp.pad(gt_bin, ((0, 0), (0, t_pad - T)))
        cas_t = jnp.pad(cas_t, ((0, 0), (0, t_pad - T)))
    label_flat = label.reshape(BC, 1).astype(jnp.float32)

    kernel = functools.partial(
        _um_loss_kernel, alpha=float(alpha), beta=float(beta),
        lmbd=float(lmbd), bkg_lmbd=float(bkg_lmbd), margin=float(margin),
        t_true=T, t_tile=t_tile)

    def full2(x):
        return pl.BlockSpec(x.shape, lambda t: (0, 0))

    def full3(x):
        return pl.BlockSpec(x.shape, lambda t: (0, 0, 0))

    # VMEM budget sized to the actual tiles (double-buffered) + small inputs +
    # elementwise temporaries, capped well under v7x's 64 MiB physical VMEM.
    tile_bytes = BC * t_tile * (4 + 2)                    # cas f32 + gt bf16
    small_bytes = 4 * (score_act.size + score_bkg.size + label.size + BC
                       + feat_act.size + feat_bkg.size)
    vmem_limit = int(min(48 * 2**20,
                         max(8 * 2**20,
                             4 * tile_bytes + 8 * BC * t_tile * 4
                             + 2 * small_bytes + 2 * 2**20)))

    out = pl.pallas_call(
        kernel,
        out_shape=jax.ShapeDtypeStruct((8, 128), jnp.float32),
        grid_spec=pltpu.PrefetchScalarGridSpec(
            num_scalar_prefetch=0,
            grid=(n_tb,),
            in_specs=[
                pl.BlockSpec((BC, t_tile), lambda t: (0, t)),   # gt (0/1, bf16)
                pl.BlockSpec((BC, t_tile), lambda t: (0, t)),   # cas (f32)
                full2(score_act), full2(score_bkg), full2(label),
                full2(label_flat), full3(feat_act), full3(feat_bkg),
            ],
            out_specs=pl.BlockSpec((8, 128), lambda t: (0, 0)),
            scratch_shapes=[pltpu.VMEM((BC, 1), jnp.float32)] * 4,
        ),
        compiler_params=pltpu.CompilerParams(
            dimension_semantics=("arbitrary",),
            vmem_limit_bytes=vmem_limit),
    )(gt_bin, cas_t, score_act, score_bkg, label, label_flat,
      feat_act, feat_bkg)

    loss = {
        'loss_sup_act': out[4, 0],
        'loss_sup_bkg': out[5, 0],
        'loss_sup': out[5, 0],   # NOTE: original module stores loss_sup_bkg here
        'loss_cls': out[1, 0],
        'loss_be': out[2, 0],
        'loss_um': out[3, 0],
        'loss_total': out[0, 0],
    }
    return out[0, 0], loss


def um_loss_reference(score_act, score_bkg, feat_act, feat_bkg, label, gt, cas,
                      *, alpha, beta, lmbd, bkg_lmbd, margin, thres):
    """Pure-JAX reference (same math as the PyTorch module) for a sanity check."""
    label_n = label / jnp.sum(label, axis=1, keepdims=True)

    def bce_mean(p, y):
        logp = jnp.maximum(jnp.log(p), -100.0)
        log1mp = jnp.maximum(jnp.log(1.0 - p), -100.0)
        return jnp.mean(-(y * logp + (1.0 - y) * log1mp))

    C = label.shape[1]
    loss_cls = bce_mean(score_act, label_n)
    loss_be = bce_mean(score_bkg, jnp.full_like(label, 1.0 / C))
    norm_act = jnp.linalg.norm(jnp.mean(feat_act, axis=1), axis=1)
    norm_bkg = jnp.linalg.norm(jnp.mean(feat_bkg, axis=1), axis=1)
    loss_um = jnp.mean((jnp.maximum(margin - norm_act, 0.0) + norm_bkg) ** 2)

    T = gt.shape[1]
    gt_b = (gt > thres).astype(jnp.float32)
    npos = jnp.sum(gt_b, axis=1)
    log_c = jnp.log(cas + 1e-5)
    log_1mc = jnp.log(1.0 - cas + 1e-5)
    r = float(T) / jnp.maximum(npos, 1.0)
    all_pos = npos == float(T)
    coef_0 = jnp.where(all_pos, 0.0, 0.5 * r / jnp.where(all_pos, 1.0, r - 1.0))
    coef_1 = jnp.where(all_pos, 1.0, 0.5 * r)
    loss_pos = jnp.mean(-coef_1[:, None, :] * gt_b * log_c
                        - coef_0[:, None, :] * (1.0 - gt_b) * log_1mc, axis=1)
    loss_nopos = jnp.mean(-(1.0 - gt_b) * log_1mc, axis=1)
    act_col = jnp.where(npos == 0.0, loss_nopos, loss_pos)
    bkg_col = jnp.mean(-log_1mc, axis=1)
    is_act = label_n > 0.0
    act_loss = jnp.sum(jnp.where(is_act, act_col, 0.0)) / jnp.sum(is_act)
    bkg_loss = (jnp.sum(jnp.where(is_act, 0.0, bkg_col)) / jnp.sum(~is_act)
                if bkg_lmbd > 0 else 0.0)
    loss_sup = lmbd * act_loss + lmbd * bkg_lmbd * bkg_loss
    return loss_cls + alpha * loss_um + beta * loss_be + loss_sup


if __name__ == "__main__":
    key = jax.random.PRNGKey(0)
    B, C, T, Tf, D = 2, 4, 16, 8, 32
    ks = jax.random.split(key, 6)

    score_act = jax.nn.sigmoid(jax.random.normal(ks[0], (B, C), jnp.float32))
    score_bkg = jax.nn.sigmoid(jax.random.normal(ks[1], (B, C), jnp.float32))
    feat_act = jax.random.normal(ks[2], (B, Tf, D), jnp.float32)
    feat_bkg = jax.random.normal(ks[3], (B, Tf, D), jnp.float32)
    # multi-hot labels: each row has both active and background classes
    label = jnp.array([[1., 0., 1., 0.],
                       [0., 1., 0., 0.]], jnp.float32)
    gt = jax.random.uniform(ks[4], (B, T, C), jnp.float32)
    cas = jax.nn.sigmoid(jax.random.normal(ks[5], (B, T, C), jnp.float32))

    hp = dict(alpha=0.0005, beta=0.2, lmbd=0.5, bkg_lmbd=0.2,
              margin=100.0, thres=0.5)

    total, losses = um_loss_forward(score_act, score_bkg, feat_act, feat_bkg,
                                    label, gt, cas, **hp)
    total = jax.block_until_ready(total)

    ref_total = float(um_loss_reference(score_act, score_bkg, feat_act, feat_bkg,
                                        label, gt, cas, **hp))
    assert abs(float(total) - ref_total) <= 1e-3 * max(1.0, abs(ref_total)), \
        (float(total), ref_total)

    print("KERNEL_OK")
</pallas_src>

<mosaic_0001>
module attributes {stable_mosaic.version = 11 : i64} {
  func.func @_um_loss_kernel(%arg0: i32, %arg1: memref<8x128xbf16, #tpu.memory_space<vmem>>, %arg2: memref<8x128xf32, #tpu.memory_space<vmem>>, %arg3: memref<2x4xf32, #tpu.memory_space<vmem>>, %arg4: memref<2x4xf32, #tpu.memory_space<vmem>>, %arg5: memref<2x4xf32, #tpu.memory_space<vmem>>, %arg6: memref<8x1xf32, #tpu.memory_space<vmem>>, %arg7: memref<2x8x32xf32, #tpu.memory_space<vmem>>, %arg8: memref<2x8x32xf32, #tpu.memory_space<vmem>>, %arg9: memref<8x128xf32, #tpu.memory_space<vmem>>, %arg10: memref<8x1xf32, #tpu.memory_space<vmem>>, %arg11: memref<8x1xf32, #tpu.memory_space<vmem>>, %arg12: memref<8x1xf32, #tpu.memory_space<vmem>>, %arg13: memref<8x1xf32, #tpu.memory_space<vmem>>) attributes {dimension_semantics = [#tpu.dimension_semantics<arbitrary>], iteration_bounds = array<i64: 1>, scalar_prefetch = 0 : i64, scratch_operands = 4 : i64, tpu.core_type = #tpu.core_type<tc>, window_params = [{transform_indices = @transform_0, window_bounds = array<i64: 8, 128>}, {transform_indices = @transform_1, window_bounds = array<i64: 8, 128>}, {pipeline_mode = #tpu.pipeline_mode<synchronous>, transform_indices = @transform_2, window_bounds = array<i64: 2, 4>}, {pipeline_mode = #tpu.pipeline_mode<synchronous>, transform_indices = @transform_3, window_bounds = array<i64: 2, 4>}, {pipeline_mode = #tpu.pipeline_mode<synchronous>, transform_indices = @transform_4, window_bounds = array<i64: 2, 4>}, {pipeline_mode = #tpu.pipeline_mode<synchronous>, transform_indices = @transform_5, window_bounds = array<i64: 8, 1>}, {pipeline_mode = #tpu.pipeline_mode<synchronous>, transform_indices = @transform_6, window_bounds = array<i64: 2, 8, 32>}, {pipeline_mode = #tpu.pipeline_mode<synchronous>, transform_indices = @transform_7, window_bounds = array<i64: 2, 8, 32>}, {pipeline_mode = #tpu.pipeline_mode<synchronous>, transform_indices = @transform_8, window_bounds = array<i64: 8, 128>}]} {
    %c0_i32 = arith.constant 0 : i32
    %0 = arith.cmpi eq, %arg0, %c0_i32 : i32
    %1 = arith.extui %0 : i1 to i32
    %c0_i32_0 = arith.constant 0 : i32
    %2 = arith.cmpi ne, %1, %c0_i32_0 : i32
    scf.if %2 {
      %cst_30 = arith.constant 0.000000e+00 : f32
      %49 = vector.broadcast %cst_30 : f32 to vector<8x1xf32>
      %c0_31 = arith.constant 0 : index
      %c0_32 = arith.constant 0 : index
      %50 = vector.load %arg10[%c0_31, %c0_32] : memref<8x1xf32, #tpu.memory_space<vmem>>, vector<8x1xf32>
      tpu.vector_store %arg10[%c0_31, %c0_32], %49 {strides = array<i32>} : memref<8x1xf32, #tpu.memory_space<vmem>>, vector<8x1xf32>,
      %cst_33 = arith.constant 0.000000e+00 : f32
      %51 = vector.broadcast %cst_33 : f32 to vector<8x1xf32>
      %c0_34 = arith.constant 0 : index
      %c0_35 = arith.constant 0 : index
      %52 = vector.load %arg11[%c0_34, %c0_35] : memref<8x1xf32, #tpu.memory_space<vmem>>, vector<8x1xf32>
      tpu.vector_store %arg11[%c0_34, %c0_35], %51 {strides = array<i32>} : memref<8x1xf32, #tpu.memory_space<vmem>>, vector<8x1xf32>,
      %cst_36 = arith.constant 0.000000e+00 : f32
      %53 = vector.broadcast %cst_36 : f32 to vector<8x1xf32>
      %c0_37 = arith.constant 0 : index
      %c0_38 = arith.constant 0 : index
      %54 = vector.load %arg12[%c0_37, %c0_38] : memref<8x1xf32, #tpu.memory_space<vmem>>, vector<8x1xf32>
      tpu.vector_store %arg12[%c0_37, %c0_38], %53 {strides = array<i32>} : memref<8x1xf32, #tpu.memory_space<vmem>>, vector<8x1xf32>,
      %cst_39 = arith.constant 0.000000e+00 : f32
      %55 = vector.broadcast %cst_39 : f32 to vector<8x1xf32>
      %c0_40 = arith.constant 0 : index
      %c0_41 = arith.constant 0 : index
      %56 = vector.load %arg13[%c0_40, %c0_41] : memref<8x1xf32, #tpu.memory_space<vmem>>, vector<8x1xf32>
      tpu.vector_store %arg13[%c0_40, %c0_41], %55 {strides = array<i32>} : memref<8x1xf32, #tpu.memory_space<vmem>>, vector<8x1xf32>,
    } else {
    }
    %c0 = arith.constant 0 : index
    %c0_1 = arith.constant 0 : index
    %3 = vector.load %arg1[%c0, %c0_1] : memref<8x128xbf16, #tpu.memory_space<vmem>>, vector<8x128xbf16>
    %4 = arith.extf %3 : vector<8x128xbf16> to vector<8x128xf32>
    %c0_2 = arith.constant 0 : index
    %c0_3 = arith.constant 0 : index
    %5 = vector.load %arg2[%c0_2, %c0_3] : memref<8x128xf32, #tpu.memory_space<vmem>>, vector<8x128xf32>
    %cst = arith.constant 9.99999974E-6 : f32
    %6 = vector.broadcast %cst : f32 to vector<8x128xf32>
    %7 = arith.addf %5, %6 : vector<8x128xf32>
    %8 = math.log %7 : vector<8x128xf32>
    %cst_4 = arith.constant 1.000000e+00 : f32
    %9 = vector.broadcast %cst_4 : f32 to vector<8x128xf32>
    %10 = arith.subf %9, %5 : vector<8x128xf32>
    %cst_5 = arith.constant 9.99999974E-6 : f32
    %11 = vector.broadcast %cst_5 : f32 to vector<8x128xf32>
    %12 = arith.addf %10, %11 : vector<8x128xf32>
    %13 = math.log %12 : vector<8x128xf32>
    %14 = tpu.iota {dimensions = array<i32: 1>} : vector<8x128xi32>
    %c128_i32 = arith.constant 128 : i32
    %15 = arith.muli %arg0, %c128_i32 : i32
    %16 = vector.broadcast %15 : i32 to vector<8x128xi32>
    %17 = arith.addi %14, %16 : vector<8x128xi32>
    %c16_i32 = arith.constant 16 : i32
    %18 = vector.broadcast %c16_i32 : i32 to vector<8x128xi32>
    %19 = arith.cmpi slt, %17, %18 : vector<8x128xi32>
    %cst_6 = arith.constant 0.000000e+00 : f32
    %20 = vector.broadcast %cst_6 : f32 to vector<8x128xf32>
    %21 = arith.select %19, %13, %20 : vector<8x128xi1>, vector<8x128xf32>
    %c0_7 = arith.constant 0 : index
    %c0_8 = arith.constant 0 : index
    %22 = vector.load %arg10[%c0_7, %c0_8] : memref<8x1xf32, #tpu.memory_space<vmem>>, vector<8x1xf32>
    %cst_9 = arith.constant dense<0.000000e+00> : vector<8xf32>
    %23 = vector.multi_reduction <add>, %4, %cst_9 [1] : vector<8x128xf32> to vector<8xf32>
    %24 = vector.shape_cast %23 : vector<8xf32> to vector<8x1xf32>
    %25 = arith.addf %22, %24 : vector<8x1xf32>
    %c0_10 = arith.constant 0 : index
    %c0_11 = arith.constant 0 : index
    %26 = vector.load %arg10[%c0_10, %c0_11] : memref<8x1xf32, #tpu.memory_space<vmem>>, vector<8x1xf32>
    tpu.vector_store %arg10[%c0_10, %c0_11], %25 {strides = array<i32>} : memref<8x1xf32, #tpu.memory_space<vmem>>, vector<8x1xf32>,
    %c0_12 = arith.constant 0 : index
    %c0_13 = arith.constant 0 : index
    %27 = vector.load %arg11[%c0_12, %c0_13] : memref<8x1xf32, #tpu.memory_space<vmem>>, vector<8x1xf32>
    %28 = arith.mulf %4, %8 : vector<8x128xf32>
    %cst_14 = arith.constant dense<0.000000e+00> : vector<8xf32>
    %29 = vector.multi_reduction <add>, %28, %cst_14 [1] : vector<8x128xf32> to vector<8xf32>
    %30 = vector.shape_cast %29 : vector<8xf32> to vector<8x1xf32>
    %31 = arith.addf %27, %30 : vector<8x1xf32>
    %c0_15 = arith.constant 0 : index
    %c0_16 = arith.constant 0 : index
    %32 = vector.load %arg11[%c0_15, %c0_16] : memref<8x1xf32, #tpu.memory_space<vmem>>, vector<8x1xf32>
    tpu.vector_store %arg11[%c0_15, %c0_16], %31 {strides = array<i32>} : memref<8x1xf32, #tpu.memory_space<vmem>>, vector<8x1xf32>,
    %c0_17 = arith.constant 0 : index
    %c0_18 = arith.constant 0 : index
    %33 = vector.load %arg12[%c0_17, %c0_18] : memref<8x1xf32, #tpu.memory_space<vmem>>, vector<8x1xf32>
    %cst_19 = arith.constant 1.000000e+00 : f32
    %34 = vector.broadcast %cst_19 : f32 to vector<8x128xf32>
    %35 = arith.subf %34, %4 : vector<8x128xf32>
    %36 = arith.mulf %35, %21 : vector<8x128xf32>
    %cst_20 = arith.constant dense<0.000000e+00> : vector<8xf32>
    %37 = vector.multi_reduction <add>, %36, %cst_20 [1] : vector<8x128xf32> to vector<8xf32>
    %38 = vector.shape_cast %37 : vector<8xf32> to vector<8x1xf32>
    %39 = arith.addf %33, %38 : vector<8x1xf32>
    %c0_21 = arith.constant 0 : index
    %c0_22 = arith.constant 0 : index
    %40 = vector.load %arg12[%c0_21, %c0_22] : memref<8x1xf32, #tpu.memory_space<vmem>>, vector<8x1xf32>
    tpu.vector_store %arg12[%c0_21, %c0_22], %39 {strides = array<i32>} : memref<8x1xf32, #tpu.memory_space<vmem>>, vector<8x1xf32>,
    %c0_23 = arith.constant 0 : index
    %c0_24 = arith.constant 0 : index
    %41 = vector.load %arg13[%c0_23, %c0_24] : memref<8x1xf32, #tpu.memory_space<vmem>>, vector<8x1xf32>
    %cst_25 = arith.constant dense<0.000000e+00> : vector<8xf32>
    %42 = vector.multi_reduction <add>, %21, %cst_25 [1] : vector<8x128xf32> to vector<8xf32>
    %43 = vector.shape_cast %42 : vector<8xf32> to vector<8x1xf32>
    %44 = arith.addf %41, %43 : vector<8x1xf32>
    %c0_26 = arith.constant 0 : index
    %c0_27 = arith.constant 0 : index
    %45 = vector.load %arg13[%c0_26, %c0_27] : memref<8x1xf32, #tpu.memory_space<vmem>>, vector<8x1xf32>
    tpu.vector_store %arg13[%c0_26, %c0_27], %44 {strides = array<i32>} : memref<8x1xf32, #tpu.memory_space<vmem>>, vector<8x1xf32>,
    %c0_i32_28 = arith.constant 0 : i32
    %46 = arith.cmpi eq, %arg0, %c0_i32_28 : i32
    %47 = arith.extui %46 : i1 to i32
    %c0_i32_29 = arith.constant 0 : i32
    %48 = arith.cmpi ne, %47, %c0_i32_29 : i32
    scf.if %48 {
      %c0_30 = arith.constant 0 : index
      %c0_31 = arith.constant 0 : index
      %49 = vector.load %arg3[%c0_30, %c0_31] : memref<2x4xf32, #tpu.memory_space<vmem>>, vector<2x4xf32>
      %c0_32 = arith.constant 0 : index
      %c0_33 = arith.constant 0 : index
      %50 = vector.load %arg4[%c0_32, %c0_33] : memref<2x4xf32, #tpu.memory_space<vmem>>, vector<2x4xf32>
      %c0_34 = arith.constant 0 : index
      %c0_35 = arith.constant 0 : index
      %51 = vector.load %arg5[%c0_34, %c0_35] : memref<2x4xf32, #tpu.memory_space<vmem>>, vector<2x4xf32>
      %cst_36 = arith.constant dense<0.000000e+00> : vector<2xf32>
      %52 = vector.multi_reduction <add>, %51, %cst_36 [1] : vector<2x4xf32> to vector<2xf32>
      %53 = vector.shape_cast %52 : vector<2xf32> to vector<2x1xf32>
      %54 = vector.broadcast %53 : vector<2x1xf32> to vector<2x4xf32>
      %55 = arith.divf %51, %54 : vector<2x4xf32>
      %56 = math.log %49 : vector<2x4xf32>
      %cst_37 = arith.constant -1.000000e+02 : f32
      %57 = vector.broadcast %cst_37 : f32 to vector<2x4xf32>
      %58 = arith.maximumf %56, %57 : vector<2x4xf32>
      %cst_38 = arith.constant 1.000000e+00 : f32
      %59 = vector.broadcast %cst_38 : f32 to vector<2x4xf32>
      %60 = arith.subf %59, %49 : vector<2x4xf32>
      %61 = math.log %60 : vector<2x4xf32>
      %cst_39 = arith.constant -1.000000e+02 : f32
      %62 = vector.broadcast %cst_39 : f32 to vector<2x4xf32>
      %63 = arith.maximumf %61, %62 : vector<2x4xf32>
      %64 = arith.mulf %55, %58 : vector<2x4xf32>
      %cst_40 = arith.constant 1.000000e+00 : f32
      %65 = vector.broadcast %cst_40 : f32 to vector<2x4xf32>
      %66 = arith.subf %65, %55 : vector<2x4xf32>
      %67 = arith.mulf %66, %63 : vector<2x4xf32>
      %68 = arith.addf %64, %67 : vector<2x4xf32>
      %cst_41 = arith.constant 0.000000e+00 : f32
      %69 = vector.broadcast %cst_41 : f32 to vector<2x4xf32>
      %70 = arith.subf %69, %68 : vector<2x4xf32>
      %71 = vector.shape_cast %70 : vector<2x4xf32> to vector<1x2x4xf32>
      %cst_42 = arith.constant dense<0.000000e+00> : vector<1xf32>
      %72 = vector.multi_reduction <add>, %71, %cst_42 [1, 2] : vector<1x2x4xf32> to vector<1xf32>
      %73 = vector.shape_cast %72 : vector<1xf32> to vector<1x1x1xf32>
      %74 = vector.extract %73[0, 0, 0] : f32 from vector<1x1x1xf32>
      %75 = vector.broadcast %74 : f32 to vector<1x1xf32>
      %cst_43 = arith.constant 8.000000e+00 : f32
      %76 = vector.broadcast %cst_43 : f32 to vector<1x1xf32>
      %77 = arith.divf %75, %76 : vector<1x1xf32>
      %cst_44 = arith.constant 2.500000e-01 : f32
      %78 = vector.broadcast %cst_44 : f32 to vector<2x4xf32>
      %79 = math.log %50 : vector<2x4xf32>
      %cst_45 = arith.constant -1.000000e+02 : f32
      %80 = vector.broadcast %cst_45 : f32 to vector<2x4xf32>
      %81 = arith.maximumf %79, %80 : vector<2x4xf32>
      %cst_46 = arith.constant 1.000000e+00 : f32
      %82 = vector.broadcast %cst_46 : f32 to vector<2x4xf32>
      %83 = arith.subf %82, %50 : vector<2x4xf32>
      %84 = math.log %83 : vector<2x4xf32>
      %cst_47 = arith.constant -1.000000e+02 : f32
      %85 = vector.broadcast %cst_47 : f32 to vector<2x4xf32>
      %86 = arith.maximumf %84, %85 : vector<2x4xf32>
      %87 = arith.mulf %78, %81 : vector<2x4xf32>
      %cst_48 = arith.constant 1.000000e+00 : f32
      %88 = vector.broadcast %cst_48 : f32 to vector<2x4xf32>
      %89 = arith.subf %88, %78 : vector<2x4xf32>
      %90 = arith.mulf %89, %86 : vector<2x4xf32>
      %91 = arith.addf %87, %90 : vector<2x4xf32>
      %cst_49 = arith.constant 0.000000e+00 : f32
      %92 = vector.broadcast %cst_49 : f32 to vector<2x4xf32>
      %93 = arith.subf %92, %91 : vector<2x4xf32>
      %94 = vector.shape_cast %93 : vector<2x4xf32> to vector<1x2x4xf32>
      %cst_50 = arith.constant dense<0.000000e+00> : vector<1xf32>
      %95 = vector.multi_reduction <add>, %94, %cst_50 [1, 2] : vector<1x2x4xf32> to vector<1xf32>
      %96 = vector.shape_cast %95 : vector<1xf32> to vector<1x1x1xf32>
      %97 = vector.extract %96[0, 0, 0] : f32 from vector<1x1x1xf32>
      %98 = vector.broadcast %97 : f32 to vector<1x1xf32>
      %cst_51 = arith.constant 8.000000e+00 : f32
      %99 = vector.broadcast %cst_51 : f32 to vector<1x1xf32>
      %100 = arith.divf %98, %99 : vector<1x1xf32>
      %c0_52 = arith.constant 0 : index
      %c0_53 = arith.constant 0 : index
      %c0_54 = arith.constant 0 : index
      %101 = vector.load %arg7[%c0_52, %c0_53, %c0_54] : memref<2x8x32xf32, #tpu.memory_space<vmem>>, vector<2x8x32xf32>
      %c0_55 = arith.constant 0 : index
      %c0_56 = arith.constant 0 : index
      %c0_57 = arith.constant 0 : index
      %102 = vector.load %arg8[%c0_55, %c0_56, %c0_57] : memref<2x8x32xf32, #tpu.memory_space<vmem>>, vector<2x8x32xf32>
      %cst_58 = arith.constant dense<0.000000e+00> : vector<2x32xf32>
      %103 = vector.multi_reduction <add>, %101, %cst_58 [1] : vector<2x8x32xf32> to vector<2x32xf32>
      %cst_59 = arith.constant 8.000000e+00 : f32
      %104 = vector.broadcast %cst_59 : f32 to vector<2x32xf32>
      %105 = arith.divf %103, %104 : vector<2x32xf32>
      %cst_60 = arith.constant dense<0.000000e+00> : vector<2x32xf32>
      %106 = vector.multi_reduction <add>, %102, %cst_60 [1] : vector<2x8x32xf32> to vector<2x32xf32>
      %cst_61 = arith.constant 8.000000e+00 : f32
      %107 = vector.broadcast %cst_61 : f32 to vector<2x32xf32>
      %108 = arith.divf %106, %107 : vector<2x32xf32>
      %109 = arith.mulf %105, %105 : vector<2x32xf32>
      %cst_62 = arith.constant dense<0.000000e+00> : vector<2xf32>
      %110 = vector.multi_reduction <add>, %109, %cst_62 [1] : vector<2x32xf32> to vector<2xf32>
      %111 = vector.shape_cast %110 : vector<2xf32> to vector<2x1xf32>
      %112 = math.sqrt %111 : vector<2x1xf32>
      %113 = arith.mulf %108, %108 : vector<2x32xf32>
      %cst_63 = arith.constant dense<0.000000e+00> : vector<2xf32>
      %114 = vector.multi_reduction <add>, %113, %cst_63 [1] : vector<2x32xf32> to vector<2xf32>
      %115 = vector.shape_cast %114 : vector<2xf32> to vector<2x1xf32>
      %116 = math.sqrt %115 : vector<2x1xf32>
      %cst_64 = arith.constant 1.000000e+02 : f32
      %117 = vector.broadcast %cst_64 : f32 to vector<2x1xf32>
      %118 = arith.subf %117, %112 : vector<2x1xf32>
      %cst_65 = arith.constant 0.000000e+00 : f32
      %119 = vector.broadcast %cst_65 : f32 to vector<2x1xf32>
      %120 = arith.maximumf %118, %119 : vector<2x1xf32>
      %121 = arith.addf %120, %116 : vector<2x1xf32>
      %122 = arith.mulf %121, %121 : vector<2x1xf32>
      %123 = vector.shape_cast %122 : vector<2x1xf32> to vector<1x2x1xf32>
      %cst_66 = arith.constant dense<0.000000e+00> : vector<1xf32>
      %124 = vector.multi_reduction <add>, %123, %cst_66 [1, 2] : vector<1x2x1xf32> to vector<1xf32>
      %125 = vector.shape_cast %124 : vector<1xf32> to vector<1x1x1xf32>
      %126 = vector.extract %125[0, 0, 0] : f32 from vector<1x1x1xf32>
      %127 = vector.broadcast %126 : f32 to vector<1x1xf32>
      %cst_67 = arith.constant 2.000000e+00 : f32
      %128 = vector.broadcast %cst_67 : f32 to vector<1x1xf32>
      %129 = arith.divf %127, %128 : vector<1x1xf32>
      %c0_68 = arith.constant 0 : index
      %c0_69 = arith.constant 0 : index
      %130 = vector.load %arg10[%c0_68, %c0_69] : memref<8x1xf32, #tpu.memory_space<vmem>>, vector<8x1xf32>
      %c0_70 = arith.constant 0 : index
      %c0_71 = arith.constant 0 : index
      %131 = vector.load %arg11[%c0_70, %c0_71] : memref<8x1xf32, #tpu.memory_space<vmem>>, vector<8x1xf32>
      %cst_72 = arith.constant 6.250000e-02 : f32
      %132 = vector.broadcast %cst_72 : f32 to vector<8x1xf32>
      %133 = arith.mulf %131, %132 : vector<8x1xf32>
      %c0_73 = arith.constant 0 : index
      %c0_74 = arith.constant 0 : index
      %134 = vector.load %arg12[%c0_73, %c0_74] : memref<8x1xf32, #tpu.memory_space<vmem>>, vector<8x1xf32>
      %cst_75 = arith.constant 6.250000e-02 : f32
      %135 = vector.broadcast %cst_75 : f32 to vector<8x1xf32>
      %136 = arith.mulf %134, %135 : vector<8x1xf32>
      %c0_76 = arith.constant 0 : index
      %c0_77 = arith.constant 0 : index
      %137 = vector.load %arg13[%c0_76, %c0_77] : memref<8x1xf32, #tpu.memory_space<vmem>>, vector<8x1xf32>
      %cst_78 = arith.constant 6.250000e-02 : f32
      %138 = vector.broadcast %cst_78 : f32 to vector<8x1xf32>
      %139 = arith.mulf %137, %138 : vector<8x1xf32>
      %cst_79 = arith.constant 1.000000e+00 : f32
      %140 = vector.broadcast %cst_79 : f32 to vector<8x1xf32>
      %141 = arith.maximumf %130, %140 : vector<8x1xf32>
      %cst_80 = arith.constant 1.600000e+01 : f32
      %142 = vector.broadcast %cst_80 : f32 to vector<8x1xf32>
      %143 = arith.divf %142, %141 : vector<8x1xf32>
      %cst_81 = arith.constant 1.600000e+01 : f32
      %144 = vector.broadcast %cst_81 : f32 to vector<8x1xf32>
      %145 = arith.cmpf oeq, %130, %144 : vector<8x1xf32>
      %cst_82 = arith.constant 1.000000e+00 : f32
      %146 = vector.broadcast %cst_82 : f32 to vector<8x1xf32>
      %147 = arith.subf %143, %146 : vector<8x1xf32>
      %cst_83 = arith.constant 1.000000e+00 : f32
      %148 = vector.broadcast %cst_83 : f32 to vector<8x1xf32>
      %149 = arith.select %145, %148, %147 : vector<8x1xi1>, vector<8x1xf32>
      %cst_84 = arith.constant 5.000000e-01 : f32
      %150 = vector.broadcast %cst_84 : f32 to vector<8x1xf32>
      %151 = arith.mulf %150, %143 : vector<8x1xf32>
      %152 = arith.divf %151, %149 : vector<8x1xf32>
      %cst_85 = arith.constant 0.000000e+00 : f32
      %153 = vector.broadcast %cst_85 : f32 to vector<8x1xf32>
      %154 = arith.select %145, %153, %152 : vector<8x1xi1>, vector<8x1xf32>
      %cst_86 = arith.constant 5.000000e-01 : f32
      %155 = vector.broadcast %cst_86 : f32 to vector<8x1xf32>
      %156 = arith.mulf %155, %143 : vector<8x1xf32>
      %cst_87 = arith.constant 1.000000e+00 : f32
      %157 = vector.broadcast %cst_87 : f32 to vector<8x1xf32>
      %158 = arith.select %145, %157, %156 : vector<8x1xi1>, vector<8x1xf32>
      %cst_88 = arith.constant 0.000000e+00 : f32
      %159 = vector.broadcast %cst_88 : f32 to vector<8x1xf32>
      %160 = arith.subf %159, %158 : vector<8x1xf32>
      %161 = arith.mulf %160, %133 : vector<8x1xf32>
      %162 = arith.mulf %154, %136 : vector<8x1xf32>
      %163 = arith.subf %161, %162 : vector<8x1xf32>
      %cst_89 = arith.constant 0.000000e+00 : f32
      %164 = vector.broadcast %cst_89 : f32 to vector<8x1xf32>
      %165 = arith.cmpf oeq, %130, %164 : vector<8x1xf32>
      %cst_90 = arith.constant 0.000000e+00 : f32
      %166 = vector.broadcast %cst_90 : f32 to vector<8x1xf32>
      %167 = arith.subf %166, %136 : vector<8x1xf32>
      %168 = arith.select %165, %167, %163 : vector<8x1xi1>, vector<8x1xf32>
      %cst_91 = arith.constant 0.000000e+00 : f32
      %169 = vector.broadcast %cst_91 : f32 to vector<8x1xf32>
      %170 = arith.subf %169, %139 : vector<8x1xf32>
      %c0_92 = arith.constant 0 : index
      %c0_93 = arith.constant 0 : index
      %171 = vector.load %arg6[%c0_92, %c0_93] : memref<8x1xf32, #tpu.memory_space<vmem>>, vector<8x1xf32>
      %cst_94 = arith.constant 0.000000e+00 : f32
      %172 = vector.broadcast %cst_94 : f32 to vector<8x1xf32>
      %173 = arith.cmpf ogt, %171, %172 : vector<8x1xf32>
      %174 = arith.extui %173 : vector<8x1xi1> to vector<8x1xi32>
      %175 = arith.sitofp %174 : vector<8x1xi32> to vector<8x1xf32>
      %176 = vector.shape_cast %175 : vector<8x1xf32> to vector<1x8x1xf32>
      %cst_95 = arith.constant dense<0.000000e+00> : vector<1xf32>
      %177 = vector.multi_reduction <add>, %176, %cst_95 [1, 2] : vector<1x8x1xf32> to vector<1xf32>
      %178 = vector.shape_cast %177 : vector<1xf32> to vector<1x1x1xf32>
      %179 = vector.extract %178[0, 0, 0] : f32 from vector<1x1x1xf32>
      %180 = vector.broadcast %179 : f32 to vector<1x1xf32>
      %cst_96 = arith.constant 1.000000e+00 : f32
      %181 = vector.broadcast %cst_96 : f32 to vector<8x1xf32>
      %182 = arith.subf %181, %175 : vector<8x1xf32>
      %183 = vector.shape_cast %182 : vector<8x1xf32> to vector<1x8x1xf32>
      %cst_97 = arith.constant dense<0.000000e+00> : vector<1xf32>
      %184 = vector.multi_reduction <add>, %183, %cst_97 [1, 2] : vector<1x8x1xf32> to vector<1xf32>
      %185 = vector.shape_cast %184 : vector<1xf32> to vector<1x1x1xf32>
      %186 = vector.extract %185[0, 0, 0] : f32 from vector<1x1x1xf32>
      %187 = vector.broadcast %186 : f32 to vector<1x1xf32>
      %cst_98 = arith.constant 0.000000e+00 : f32
      %188 = vector.broadcast %cst_98 : f32 to vector<1x1xf32>
      %189 = arith.cmpf ogt, %180, %188 : vector<1x1xf32>
      %190 = arith.mulf %175, %168 : vector<8x1xf32>
      %191 = vector.shape_cast %190 : vector<8x1xf32> to vector<1x8x1xf32>
      %cst_99 = arith.constant dense<0.000000e+00> : vector<1xf32>
      %192 = vector.multi_reduction <add>, %191, %cst_99 [1, 2] : vector<1x8x1xf32> to vector<1xf32>
      %193 = vector.shape_cast %192 : vector<1xf32> to vector<1x1x1xf32>
      %194 = vector.extract %193[0, 0, 0] : f32 from vector<1x1x1xf32>
      %195 = vector.broadcast %194 : f32 to vector<1x1xf32>
      %cst_100 = arith.constant 1.000000e+00 : f32
      %196 = vector.broadcast %cst_100 : f32 to vector<1x1xf32>
      %197 = arith.maximumf %180, %196 : vector<1x1xf32>
      %198 = arith.divf %195, %197 : vector<1x1xf32>
      %cst_101 = arith.constant 0.000000e+00 : f32
      %199 = vector.broadcast %cst_101 : f32 to vector<1x1xf32>
      %200 = arith.select %189, %198, %199 : vector<1x1xi1>, vector<1x1xf32>
      %cst_102 = arith.constant 0.000000e+00 : f32
      %201 = vector.broadcast %cst_102 : f32 to vector<1x1xf32>
      %202 = arith.cmpf ogt, %187, %201 : vector<1x1xf32>
      %cst_103 = arith.constant 1.000000e+00 : f32
      %203 = vector.broadcast %cst_103 : f32 to vector<8x1xf32>
      %204 = arith.subf %203, %175 : vector<8x1xf32>
      %205 = arith.mulf %204, %170 : vector<8x1xf32>
      %206 = vector.shape_cast %205 : vector<8x1xf32> to vector<1x8x1xf32>
      %cst_104 = arith.constant dense<0.000000e+00> : vector<1xf32>
      %207 = vector.multi_reduction <add>, %206, %cst_104 [1, 2] : vector<1x8x1xf32> to vector<1xf32>
      %208 = vector.shape_cast %207 : vector<1xf32> to vector<1x1x1xf32>
      %209 = vector.extract %208[0, 0, 0] : f32 from vector<1x1x1xf32>
      %210 = vector.broadcast %209 : f32 to vector<1x1xf32>
      %cst_105 = arith.constant 1.000000e+00 : f32
      %211 = vector.broadcast %cst_105 : f32 to vector<1x1xf32>
      %212 = arith.maximumf %187, %211 : vector<1x1xf32>
      %213 = arith.divf %210, %212 : vector<1x1xf32>
      %cst_106 = arith.constant 0.000000e+00 : f32
      %214 = vector.broadcast %cst_106 : f32 to vector<1x1xf32>
      %215 = arith.select %202, %213, %214 : vector<1x1xi1>, vector<1x1xf32>
      %cst_107 = arith.constant 5.000000e-01 : f32
      %216 = vector.broadcast %cst_107 : f32 to vector<1x1xf32>
      %217 = arith.mulf %216, %200 : vector<1x1xf32>
      %cst_108 = arith.constant 1.000000e-01 : f32
      %218 = vector.broadcast %cst_108 : f32 to vector<1x1xf32>
      %219 = arith.mulf %218, %215 : vector<1x1xf32>
      %220 = arith.addf %217, %219 : vector<1x1xf32>
      %cst_109 = arith.constant 5.000000e-04 : f32
      %221 = vector.broadcast %cst_109 : f32 to vector<1x1xf32>
      %222 = arith.mulf %221, %129 : vector<1x1xf32>
      %223 = arith.addf %77, %222 : vector<1x1xf32>
      %cst_110 = arith.constant 2.000000e-01 : f32
      %224 = vector.broadcast %cst_110 : f32 to vector<1x1xf32>
      %225 = arith.mulf %224, %100 : vector<1x1xf32>
      %226 = arith.addf %223, %225 : vector<1x1xf32>
      %227 = arith.addf %226, %220 : vector<1x1xf32>
      %cst_111 = arith.constant 0.000000e+00 : f32
      %228 = vector.broadcast %cst_111 : f32 to vector<8x128xf32>
      %c0_112 = arith.constant 0 : index
      %c0_113 = arith.constant 0 : index
      %229 = vector.load %arg9[%c0_112, %c0_113] : memref<8x128xf32, #tpu.memory_space<vmem>>, vector<8x128xf32>
      tpu.vector_store %arg9[%c0_112, %c0_113], %228 {strides = array<i32>} : memref<8x128xf32, #tpu.memory_space<vmem>>, vector<8x128xf32>,
      %230 = vector.shape_cast %227 : vector<1x1xf32> to vector<1x1xf32>
      %231 = vector.broadcast %230 : vector<1x1xf32> to vector<1x128xf32>
      %c0_114 = arith.constant 0 : index
      %c0_115 = arith.constant 0 : index
      %232 = vector.load %arg9[%c0_114, %c0_115] : memref<8x128xf32, #tpu.memory_space<vmem>>, vector<1x128xf32>
      tpu.vector_store %arg9[%c0_114, %c0_115], %231 {strides = array<i32>} : memref<8x128xf32, #tpu.memory_space<vmem>>, vector<1x128xf32>,
      %233 = vector.shape_cast %77 : vector<1x1xf32> to vector<1x1xf32>
      %234 = vector.broadcast %233 : vector<1x1xf32> to vector<1x128xf32>
      %c1 = arith.constant 1 : index
      %c0_116 = arith.constant 0 : index
      %235 = vector.load %arg9[%c1, %c0_116] : memref<8x128xf32, #tpu.memory_space<vmem>>, vector<1x128xf32>
      tpu.vector_store %arg9[%c1, %c0_116], %234 {strides = array<i32>} : memref<8x128xf32, #tpu.memory_space<vmem>>, vector<1x128xf32>,
      %236 = vector.shape_cast %100 : vector<1x1xf32> to vector<1x1xf32>
      %237 = vector.broadcast %236 : vector<1x1xf32> to vector<1x128xf32>
      %c2 = arith.constant 2 : index
      %c0_117 = arith.constant 0 : index
      %238 = vector.load %arg9[%c2, %c0_117] : memref<8x128xf32, #tpu.memory_space<vmem>>, vector<1x128xf32>
      tpu.vector_store %arg9[%c2, %c0_117], %237 {strides = array<i32>} : memref<8x128xf32, #tpu.memory_space<vmem>>, vector<1x128xf32>,
      %239 = vector.shape_cast %129 : vector<1x1xf32> to vector<1x1xf32>
      %240 = vector.broadcast %239 : vector<1x1xf32> to vector<1x128xf32>
      %c3 = arith.constant 3 : index
      %c0_118 = arith.constant 0 : index
      %241 = vector.load %arg9[%c3, %c0_118] : memref<8x128xf32, #tpu.memory_space<vmem>>, vector<1x128xf32>
      tpu.vector_store %arg9[%c3, %c0_118], %240 {strides = array<i32>} : memref<8x128xf32, #tpu.memory_space<vmem>>, vector<1x128xf32>,
      %242 = vector.shape_cast %217 : vector<1x1xf32> to vector<1x1xf32>
      %243 = vector.broadcast %242 : vector<1x1xf32> to vector<1x128xf32>
      %c4 = arith.constant 4 : index
      %c0_119 = arith.constant 0 : index
      %244 = vector.load %arg9[%c4, %c0_119] : memref<8x128xf32, #tpu.memory_space<vmem>>, vector<1x128xf32>
      tpu.vector_store %arg9[%c4, %c0_119], %243 {strides = array<i32>} : memref<8x128xf32, #tpu.memory_space<vmem>>, vector<1x128xf32>,
      %245 = vector.shape_cast %219 : vector<1x1xf32> to vector<1x1xf32>
      %246 = vector.broadcast %245 : vector<1x1xf32> to vector<1x128xf32>
      %c5 = arith.constant 5 : index
      %c0_120 = arith.constant 0 : index
      %247 = vector.load %arg9[%c5, %c0_120] : memref<8x128xf32, #tpu.memory_space<vmem>>, vector<1x128xf32>
      tpu.vector_store %arg9[%c5, %c0_120], %246 {strides = array<i32>} : memref<8x128xf32, #tpu.memory_space<vmem>>, vector<1x128xf32>,
      %248 = vector.shape_cast %220 : vector<1x1xf32> to vector<1x1xf32>
      %249 = vector.broadcast %248 : vector<1x1xf32> to vector<1x128xf32>
      %c6 = arith.constant 6 : index
      %c0_121 = arith.constant 0 : index
      %250 = vector.load %arg9[%c6, %c0_121] : memref<8x128xf32, #tpu.memory_space<vmem>>, vector<1x128xf32>
      tpu.vector_store %arg9[%c6, %c0_121], %249 {strides = array<i32>} : memref<8x128xf32, #tpu.memory_space<vmem>>, vector<1x128xf32>,
    } else {
    }
    return
  }
  func.func @transform_0(%arg0: i32) -> (i32, i32) {
    %c0_i32 = arith.constant 0 : i32
    %c0_i32_0 = arith.constant 0 : i32
    return %c0_i32, %arg0 : i32, i32
  }
  func.func @transform_1(%arg0: i32) -> (i32, i32) {
    %c0_i32 = arith.constant 0 : i32
    %c0_i32_0 = arith.constant 0 : i32
    return %c0_i32, %arg0 : i32, i32
  }
  func.func @transform_2(%arg0: i32) -> (i32, i32) {
    %c0_i32 = arith.constant 0 : i32
    %c0_i32_0 = arith.constant 0 : i32
    %c0_i32_1 = arith.constant 0 : i32
    return %c0_i32, %c0_i32_0 : i32, i32
  }
  func.func @transform_3(%arg0: i32) -> (i32, i32) {
    %c0_i32 = arith.constant 0 : i32
    %c0_i32_0 = arith.constant 0 : i32
    %c0_i32_1 = arith.constant 0 : i32
    return %c0_i32, %c0_i32_0 : i32, i32
  }
  func.func @transform_4(%arg0: i32) -> (i32, i32) {
    %c0_i32 = arith.constant 0 : i32
    %c0_i32_0 = arith.constant 0 : i32
    %c0_i32_1 = arith.constant 0 : i32
    return %c0_i32, %c0_i32_0 : i32, i32
  }
  func.func @transform_5(%arg0: i32) -> (i32, i32) {
    %c0_i32 = arith.constant 0 : i32
    %c0_i32_0 = arith.constant 0 : i32
    %c0_i32_1 = arith.constant 0 : i32
    return %c0_i32, %c0_i32_0 : i32, i32
  }
  func.func @transform_6(%arg0: i32) -> (i32, i32, i32) {
    %c0_i32 = arith.constant 0 : i32
    %c0_i32_0 = arith.constant 0 : i32
    %c0_i32_1 = arith.constant 0 : i32
    %c0_i32_2 = arith.constant 0 : i32
    return %c0_i32, %c0_i32_0, %c0_i32_1 : i32, i32, i32
  }
  func.func @transform_7(%arg0: i32) -> (i32, i32, i32) {
    %c0_i32 = arith.constant 0 : i32
    %c0_i32_0 = arith.constant 0 : i32
    %c0_i32_1 = arith.constant 0 : i32
    %c0_i32_2 = arith.constant 0 : i32
    return %c0_i32, %c0_i32_0, %c0_i32_1 : i32, i32, i32
  }
  func.func @transform_8(%arg0: i32) -> (i32, i32) {
    %c0_i32 = arith.constant 0 : i32
    %c0_i32_0 = arith.constant 0 : i32
    %c0_i32_1 = arith.constant 0 : i32
    return %c0_i32, %c0_i32_0 : i32, i32
  }
}

</mosaic_0001>

<bundles_post_ra>
// kernel: tpu_custom_call.1
= control target key start
LH: loop header
LB: loop body
LE: loop exit
PB: predicated region body
PF: predicated region fallthrough
CT: control target
= control target key end

     0   :  { %13 = vsyncpa [#allocation7], 0  ;;  %s737_s0 = inlined_call_operand.hbm [shape: bf16[8,128], index: 0, kind: input, shape index: {}]   ;;  %s738_s1 = inlined_call_operand.hbm [shape: f32[8,128], index: 1, kind: input, shape index: {}]   ;;  %s739_s2 = inlined_call_operand.vmem [shape: f32[2,4], index: 2, kind: input, shape index: {}]   ;;  %s740_s3 = inlined_call_operand.hbm [shape: f32[2,4], index: 3, kind: input, shape index: {}]   ;;  %s741_s4 = inlined_call_operand.hbm [shape: f32[2,4], index: 4, kind: input, shape index: {}]   ;;  %s742_s5 = inlined_call_operand.vmem [shape: f32[8,1], index: 5, kind: input, shape index: {}]   ;;  %s743_s6 = inlined_call_operand.vmem [shape: f32[2,8,32], index: 6, kind: input, shape index: {}]   ;;  %s744_s7 = inlined_call_operand.vmem [shape: f32[2,8,32], index: 7, kind: input, shape index: {}]   ;;  %s745_s8 = inlined_call_operand.hbm [shape: f32[8,128], index: 8, kind: output, shape index: {}]  }
   0x1   :  { %14 = vsyncpa [#allocation10], 0 }
   0x2   :  { %15 = vsyncpa [#allocation13], 0 }
   0x3   :  { %16 = vsyncpa [#allocation8], 0  ;;  %s562_s27 = smov [#allocation9]   ;;  %s563_s29 = smov [#allocation6]  }
   0x4   :  { %s33_s28 = sshll.u32 %s562_s27, 4  ;;  %s23_s30 = sshll.u32 %s563_s29, 4  ;;  %s34_s28 = int_to_ptr.vmem [resolvable:$true] %s33_s28  ;;  %s24_s30 = int_to_ptr.vmem [resolvable:$true] %s23_s30 }
   0x5   :  { %s444_s11 = scalar_lea.hbm %s738_s1, 128 }
   0x6   :  { %p445_p0 = scmp.ne.s32.totalorder %s738_s1, %s444_s11  ;;  %p448_p1 = scmp.lt.u32.totalorder %s444_s11, %s738_s1 }
   0x8   :  { %p450_p2 = pnand %p448_p1, %p445_p0 }
   0xa   :  { %453 = shalt.err (!%p450_p2)
}
   0xb   :  { %s454_s16 = scalar_lea.vmem %s34_s28, 128  ;;  %p459_p4 = scmp.lt.s32.totalorder %s34_s28, %s34_s28 }
   0xc   :  { %p455_p3 = scmp.ne.s32.totalorder %s34_s28, %s454_s16  ;;  %p460_p5 = scmp.lt.s32.totalorder %s454_s16, %s454_s16 }
   0xe   :  { %p461_p6 = por %p460_p5, %p459_p4 }
  0x10   :  { %p462_p7 = pnand %p461_p6, %p455_p3 }
  0x12   :  { %465 = shalt.err (!%p462_p7)
}
  0x13   :  { %36 = dma.hbm_to_vmem [thread:$0]  %s738_s1, 128, %s34_s28, [#allocation10]  }
  0x14   :  { %s466_s21 = scalar_lea.hbm %s737_s0, 64 }
  0x15   :  { %p467_p8 = scmp.ne.s32.totalorder %s737_s0, %s466_s21  ;;  %p470_p9 = scmp.lt.u32.totalorder %s466_s21, %s737_s0 }
  0x17   :  { %p472_p10 = pnand %p470_p9, %p467_p8 }
  0x19   :  { %475 = shalt.err (!%p472_p10)
}
  0x1a   :  { %s476_s26 = scalar_lea.vmem %s24_s30, 64  ;;  %p481_p12 = scmp.lt.s32.totalorder %s24_s30, %s24_s30 }
  0x1b   :  { %p477_p11 = scmp.ne.s32.totalorder %s24_s30, %s476_s26  ;;  %p482_p13 = scmp.lt.s32.totalorder %s476_s26, %s476_s26 }
  0x1d   :  { %p483_p0 = por %p482_p13, %p481_p12 }
  0x1f   :  { %p484_p1 = pnand %p483_p0, %p477_p11 }
  0x21   :  { %487 = shalt.err (!%p484_p1)
}
  0x22   :  { %26 = dma.hbm_to_vmem [thread:$0]  %s737_s0, 64, %s24_s30, [#allocation7]  }
  0x23   :  { %s564_s28 = smov [#allocation11]   ;;  %s565_s9 = smov [#allocation12]  }
  0x24   :  { %s45_s29 = sshll.u32 %s564_s28, 4  ;;  %s55_s10 = sshll.u32 %s565_s9, 4  ;;  %s46_s29 = int_to_ptr.vmem [resolvable:$true] %s45_s29  ;;  %s56_s10 = int_to_ptr.vmem [resolvable:$true] %s55_s10 }
  0x25   :  { %s488_s13 = scalar_lea.hbm %s740_s3, 32 }
  0x26   :  { %p489_p2 = scmp.ne.s32.totalorder %s740_s3, %s488_s13  ;;  %p492_p3 = scmp.lt.u32.totalorder %s488_s13, %s740_s3 }
  0x28   :  { %p494_p4 = pnand %p492_p3, %p489_p2 }
  0x2a   :  { %497 = shalt.err (!%p494_p4)
}
  0x2b   :  { %s498_s0 = scalar_lea.vmem %s46_s29, 32  ;;  %p503_p6 = scmp.lt.s32.totalorder %s46_s29, %s46_s29 }
  0x2c   :  { %p499_p5 = scmp.ne.s32.totalorder %s46_s29, %s498_s0  ;;  %p504_p7 = scmp.lt.s32.totalorder %s498_s0, %s498_s0 }
  0x2e   :  { %p505_p8 = por %p504_p7, %p503_p6 }
  0x30   :  { %p506_p9 = pnand %p505_p8, %p499_p5 }
  0x32   :  { %509 = shalt.err (!%p506_p9)
}
  0x33   :  { %48 = dma.hbm_to_vmem [thread:$0]  %s740_s3, 32, %s46_s29, [#allocation10]  }
  0x34   :  { %s510_s21 = scalar_lea.hbm %s741_s4, 32 }
  0x35   :  { %p511_p10 = scmp.ne.s32.totalorder %s741_s4, %s510_s21  ;;  %p514_p11 = scmp.lt.u32.totalorder %s510_s21, %s741_s4 }
  0x37   :  { %p516_p12 = pnand %p514_p11, %p511_p10 }
  0x39   :  { %519 = shalt.err (!%p516_p12)
}
  0x3a   :  { %s520_s26 = scalar_lea.vmem %s56_s10, 32  ;;  %p525_p0 = scmp.lt.s32.totalorder %s56_s10, %s56_s10 }
  0x3b   :  { %p521_p13 = scmp.ne.s32.totalorder %s56_s10, %s520_s26  ;;  %p526_p1 = scmp.lt.s32.totalorder %s520_s26, %s520_s26 }
  0x3d   :  { %p527_p2 = por %p526_p1, %p525_p0 }
  0x3f   :  { %p528_p3 = pnand %p527_p2, %p521_p13 }
  0x41   :  { %531 = shalt.err (!%p528_p3)
}
  0x42   :  { %58 = dma.hbm_to_vmem [thread:$0]  %s741_s4, 32, %s56_s10, [#allocation13]  }
  0x43   :  { %554 = dma.done.wait [#allocation7], 64  }
  0x44   :  { %555 = vsyncadd [#allocation7], 4294967232 }
  0x45   :  { %556 = dma.done.wait [#allocation10], 160  }
  0x46   :  { %557 = vsyncadd [#allocation10], 4294967136 }
  0x47   :  { %558 = dma.done.wait [#allocation13], 32  }
  0x48   :  { %559 = vsyncadd [#allocation13], 4294967264  ;;  %vm81_vm0 = vcmask 7168   ;;  %v566_v0 = vmov 0.0   ;;  %vm133_vm1 = vcmask 25600   ;;  %vm191_vm2 = vcmask 261120  }
  0x49   :  { %82 = vst.msk [vmem:[#allocation2] sm:$0xff] %vm81_vm0, %v566_v0  ;;  %83 = vst.msk [vmem:[#allocation3] sm:$0xff] %vm81_vm0, %v566_v0  ;;  %v86_v1 = vld [vmem:[#allocation6] sm:$0xf]  ;;  %v670_v2 = vld [vmem:[#allocation12] sm:$0x3]  ;;  %v96_v34 = vlaneseq }
  0x4a   :  { %84 = vst.msk [vmem:[#allocation4] sm:$0xff] %vm81_vm0, %v566_v0  ;;  %85 = vst.msk [vmem:[#allocation5] sm:$0xff] %vm81_vm0, %v566_v0  ;;  %v189_v3 = vld [vmem:[%s744_s7] sm:$0xff]  ;;  %v675_v4 = vunpack.c.l.bf16 %v86_v1  ;;  %v134_v5 = vsel %vm133_vm1, %v670_v2, 0.0  ;;  %v190_v6 = vld [vmem:[%s744_s7 + $0x8] sm:$0xff]  ;;  %vm228_vm3 = vcmask 1041409  }
  0x4b   :  { %371 = vst [vmem:[#allocation14] sm:$0xff] %v566_v0  ;;  %v208_v7 = vsel %vm191_vm2, %v189_v3, 0.0  ;;  %v187_v8 = vld [vmem:[%s743_s6] sm:$0xff]  ;;  %v188_v9 = vld [vmem:[%s743_s6 + $0x8] sm:$0xff]  ;;  %135 = vadd.xlane.f32.xlu1 %v134_v5  ;;  %v215_v11 = vsel %vm191_vm2, %v190_v6, 0.0  ;;  %v97_v43 = vand.u32 127, %v96_v34 }
  0x4c   :  { %v209_v10 = vrot.slane %v208_v7, 4  ;;  %v192_v12 = vsel %vm191_vm2, %v187_v8, 0.0  ;;  %v199_v13 = vsel %vm191_vm2, %v188_v9, 0.0  ;;  %v88_v14 = vld [vmem:[#allocation9] sm:$0xff]  ;;  %104 = vadd.xlane.f32.xlu0 %v675_v4  ;;  %v216_v15 = vrot.slane %v215_v11, 4  ;;  %s567_s18 = smov [#allocation14]  }
  0x4d   :  { %v193_v16 = vrot.slane %v192_v12, 4  ;;  %v200_v17 = vrot.slane %v199_v13, 4  ;;  %v89_v18 = vadd.f32 1e-05, %v88_v14  ;;  %v92_v20 = vsub.f32 1.0, %v88_v14  ;;  %s385_s19 = sshll.u32 %s567_s18, 4  ;;  %s386_s19 = int_to_ptr.vmem [resolvable:$true] %s385_s19 }
  0x4e   :  { %v210_v19 = vadd.f32 %v209_v10, %v208_v7  ;;  %v217_v21 = vadd.f32 %v216_v15, %v215_v11  ;;  %vm231_vm4 = vcmask 254976   ;;  %vm101_vm5 = vcmp.lt.s32.totalorder %v97_v43, 16  ;;  %v131_v63 = vld [vmem:[#allocation11] sm:$0x3]  ;;  %s532_s20 = scalar_lea.vmem %s386_s19, 128  ;;  %p537_p5 = scmp.lt.s32.totalorder %s386_s19, %s386_s19 }
  0x4f   :  { %v194_v22 = vadd.f32 %v193_v16, %v192_v12  ;;  %v201_v23 = vadd.f32 %v200_v17, %v199_v13  ;;  %418 = vlog2.f32 %v89_v18  ;;  %v93_v25 = vadd.f32 1e-05, %v92_v20  ;;  %v130_v17 = vld [vmem:[%s739_s2] sm:$0x3]  ;;  %p533_p4 = scmp.ne.s32.totalorder %s386_s19, %s532_s20  ;;  %p538_p6 = scmp.lt.s32.totalorder %s532_s20, %s532_s20 }
  0x50   :  { %v211_v24 = vrot.slane %v210_v19, 2  ;;  %v218_v26 = vrot.slane %v217_v21, 2  ;;  %v116_v54 = vsub.f32 1.0, %v675_v4  ;;  %v167_v1 = vsub.f32 1.0, %v131_v63 }
  0x51   :  { %v195_v27 = vrot.slane %v194_v22, 2  ;;  %v202_v28 = vrot.slane %v201_v23, 2  ;;  %420 = vlog2.f32 %v93_v25  ;;  %v142_v18 = vsub.f32 1.0, %v130_v17  ;;  %p539_p7 = por %p538_p6, %p537_p5 }
  0x52   :  { %v212_v29 = vadd.f32 %v211_v24, %v210_v19  ;;  %v219_v30 = vadd.f32 %v218_v26, %v217_v21  ;;  %422 = vlog2.f32 %v131_v63  ;;  %v103_v19 = vld [vmem:[#allocation2] sm:$0xff]  ;;  %vm262_vm12 = vcmask 1024  }
  0x53   :  { %v196_v31 = vadd.f32 %v195_v27, %v194_v22  ;;  %v203_v32 = vadd.f32 %v202_v28, %v201_v23  ;;  %424 = vlog2.f32 %v167_v1  ;;  %p540_p8 = pnand %p539_p7, %p533_p4 }
  0x54   :  { %v213_v33 = vrot.slane %v212_v29, 1  ;;  %v220_v35 = vrot.slane %v219_v30, 1  ;;  %426 = vlog2.f32 %v130_v17 }
  0x55   :  { %v197_v36 = vrot.slane %v196_v31, 1  ;;  %v204_v37 = vrot.slane %v203_v32, 1  ;;  %428 = vlog2.f32 %v142_v18 }
  0x56   :  { %v214_v38 = vadd.f32 %v213_v33, %v212_v29  ;;  %v221_v39 = vadd.f32 %v220_v35, %v219_v30 }
  0x57   :  { %v198_v40 = vadd.f32 %v197_v36, %v196_v31  ;;  %v205_v41 = vadd.f32 %v204_v37, %v203_v32 }
  0x58   :  { %v222_v42 = vmul.f32 0.125, %v214_v38  ;;  %v223_v45 = vmul.f32 0.125, %v221_v39  ;;  %v109_v39 = vld [vmem:[#allocation3] sm:$0xff] }
  0x59   :  { %v419_v44 = vpop.eup %418  ;;  %v206_v46 = vmul.f32 0.125, %v198_v40  ;;  %v207_v47 = vmul.f32 0.125, %v205_v41  ;;  %v115_v40 = vld [vmem:[#allocation4] sm:$0xff] }
  0x5a   :  { %v242_v48 = vmul.f32 %v222_v42, %v222_v42  ;;  %v243_v49 = vmul.f32 %v223_v45, %v223_v45  ;;  %v91_v52 = vmul.f32 0.6931472, %v419_v44 }
  0x5b   :  { %v224_v50 = vmul.f32 %v206_v46, %v206_v46  ;;  %v225_v51 = vmul.f32 %v207_v47, %v207_v47  ;;  %v421_v53 = vpop.eup %420  ;;  %v122_v46 = vld [vmem:[#allocation5] sm:$0xff] }
  0x5c   :  { %v246_v55 = vsel %vm228_vm3, %v243_v49, %v242_v48  ;;  %v95_v57 = vmul.f32 0.6931472, %v421_v53  ;;  %v110_v60 = vmul.f32 %v91_v52, %v675_v4  ;;  %v423_v3 = vpop.eup %422  ;;  %v302_v4 = vld [vmem:[%s742_s5] sm:$0xff] }
  0x5d   :  { %v229_v56 = vsel %vm228_vm3, %v225_v51, %v224_v50  ;;  %v248_v58 = vsel %vm231_vm4, %v246_v55, 0.0  ;;  %v425_v5 = vpop.eup %424  ;;  %v165_v6 = vmul.f32 0.6931472, %v423_v3  ;;  %vm303_vm6 = vcmp.gt.f32.partialorder %v302_v4, 0.0 }
  0x5e   :  { %v232_v59 = vsel %vm231_vm4, %v229_v56, 0.0  ;;  %249 = vadd.xlane.f32.xlu1 %v248_v58  ;;  %v102_v61 = vsel %vm101_vm5, %v95_v57, 0.0  ;;  %v169_v7 = vmul.f32 0.6931472, %v425_v5  ;;  %v695_v14 = vsel %vm303_vm6, 1.0, %v566_v0  ;;  %v427_v22 = vpop.eup %426 }
  0x5f   :  { %233 = vadd.xlane.f32.xlu0 %v232_v59  ;;  %v117_v62 = vmul.f32 %v116_v54, %v102_v61  ;;  %v166_v8 = vmax.f32 %v165_v6, -100.0  ;;  %v306_v16 = vsel %vm81_vm0, %v695_v14, 0.0  ;;  %v429_v23 = vpop.eup %428  ;;  %v140_v24 = vmul.f32 0.6931472, %v427_v22 }
  0x60   :  { %v170_v9 = vmax.f32 %v169_v7, -100.0  ;;  %v144_v25 = vmul.f32 0.6931472, %v429_v23 }
  0x61   :  { %v171_v10 = vmul.f32 0.25, %v166_v8  ;;  %v141_v26 = vmax.f32 %v140_v24, -100.0 }
  0x62   :  { %118 = vadd.xlane.f32.xlu1 %v117_v62  ;;  %v172_v11 = vmul.f32 0.75, %v170_v9  ;;  %v145_v30 = vmax.f32 %v144_v25, -100.0 }
  0x63   :  { %111 = vadd.xlane.f32.xlu0 %v110_v60 }
  0x64   :  { %v173_v12 = vadd.f32 %v172_v11, %v171_v10 }
  0x66   :  { %v174_v13 = vsub.f32 0.0, %v173_v12 }
  0x67   :  { %123 = vadd.xlane.f32.xlu0 %v102_v61 }
  0x68   :  { %v175_v15 = vsel %vm133_vm1, %v174_v13, 0.0 }
  0x6b   :  { %176 = vadd.xlane.f32.xlu0 %v175_v15  ;;  %v317_v15 = vsub.f32 1.0, %v695_v14 }
  0x6d   :  { %v318_v22 = vsel %vm81_vm0, %v317_v15, 0.0 }
  0x6f   :  { %307 = vadd.xlane.f32.xlu0 %v306_v16 }
  0xd8   :  { %v136_v20 = vpop.xlane.xlu1 %135 }
  0xd9   :  { %v105_v21 = vpop.xlane.xlu0 %104  ;;  %430 = vrcp.f32 %v136_v20 }
  0xda   :  { %v106_v0 = vadd.f32 %v105_v21, %v103_v19 }
  0xdc   :  { %108 = vst.msk [vmem:[#allocation2] sm:$0xff] %vm81_vm0, %v106_v0 }
  0xe3   :  { %v431_v27 = vpop.eup %430  ;;  %v704_v28 = vld [vmem:[#allocation2] sm:$0xff] }
  0xe4   :  { %v138_v29 = vmul.f32 %v431_v27, %v670_v2  ;;  %v283_v31 = vmax.f32 %v704_v28, 1.0  ;;  %vm286_vm7 = vcmp.eq.f32.partialorder %v704_v28, 16.0  ;;  %vm298_vm13 = vcmp.eq.f32.partialorder %v704_v28, 0.0 }
  0xe6   :  { %v146_v32 = vmul.f32 %v141_v26, %v138_v29  ;;  %v147_v33 = vsub.f32 1.0, %v138_v29  ;;  %432 = vrcp.f32 %v283_v31 }
  0xe8   :  { %v148_v34 = vmul.f32 %v147_v33, %v145_v30 }
  0xea   :  { %v149_v35 = vadd.f32 %v148_v34, %v146_v32 }
  0xeb   :  { %v250_v36 = vpop.xlane.xlu1 %249 }
  0xec   :  { %v234_v37 = vpop.xlane.xlu0 %233  ;;  %434 = vrsqrt.f32 %v250_v36  ;;  %v150_v38 = vsub.f32 0.0, %v149_v35  ;;  %vm253_vm10 = vcmp.eq.f32.partialorder %v250_v36, inf  ;;  %v256_v62 = vand.u32 2147483648, %v250_v36 }
  0xed   :  { %436 = vrsqrt.f32 %v234_v37  ;;  %vm237_vm8 = vcmp.eq.f32.partialorder %v234_v37, inf  ;;  %v240_v56 = vand.u32 2147483648, %v234_v37  ;;  %vm239_vm9 = vcmp.eq.f32.partialorder %v234_v37, 0.0 }
  0xee   :  { %v151_v41 = vsel %vm133_vm1, %v150_v38, 0.0  ;;  %vm255_vm11 = vcmp.eq.f32.partialorder %v250_v36, 0.0 }
  0xef   :  { %152 = vadd.xlane.f32.xlu1 %v151_v41  ;;  %v119_v2 = vpop.xlane.xlu1 %118 }
  0xf0   :  { %v112_v42 = vpop.xlane.xlu0 %111  ;;  %v433_v43 = vpop.eup %432  ;;  %v120_v45 = vadd.f32 %v119_v2, %v115_v40 }
  0xf1   :  { %v113_v44 = vadd.f32 %v112_v42, %v109_v39  ;;  %v285_v47 = vmul.f32 16.0, %v433_v43 }
  0xf2   :  { %121 = vst.msk [vmem:[#allocation4] sm:$0xff] %vm81_vm0, %v120_v45 }
  0xf3   :  { %114 = vst.msk [vmem:[#allocation3] sm:$0xff] %vm81_vm0, %v113_v44  ;;  %v396_v49 = vadd.f32 -1.0, %v285_v47  ;;  %v289_v59 = vmul.f32 0.5, %v285_v47 }
  0xf4   :  { %v124_v48 = vpop.xlane.xlu0 %123 }
  0xf5   :  { %v125_v50 = vadd.f32 %v124_v48, %v122_v46  ;;  %v288_v51 = vsel %vm286_vm7, 1.0, %v396_v49  ;;  %v293_v8 = vsel %vm286_vm7, 1.0, %v289_v59 }
  0xf6   :  { %v435_v52 = vpop.eup %434  ;;  %438 = vrcp.f32 %v288_v51  ;;  %v294_v16 = vsub.f32 0.0, %v293_v8 }
  0xf7   :  { %126 = vst.msk [vmem:[#allocation5] sm:$0xff] %vm81_vm0, %v125_v50  ;;  %v437_v53 = vpop.eup %436  ;;  %v252_v55 = vmul.f32 %v435_v52, %v250_v36 }
  0xf8   :  { %v236_v54 = vmul.f32 %v437_v53, %v234_v37  ;;  %v177_v30 = vpop.xlane.xlu0 %176 }
  0xf9   :  { %v254_v60 = vsel %vm253_vm10, %v250_v36, %v252_v55  ;;  %v279_v1 = vld [vmem:[#allocation4] sm:$0xff]  ;;  %v178_v31 = vrot.slane %v177_v30, 4 }
  0xfa   :  { %v238_v57 = vsel %vm237_vm8, %v234_v37, %v236_v54  ;;  %v277_v63 = vld [vmem:[#allocation3] sm:$0xff]  ;;  %v257_v7 = vsel %vm255_vm11, %v256_v62, %v254_v60  ;;  %v280_v11 = vmul.f32 0.0625, %v279_v1 }
  0xfb   :  { %v241_v58 = vsel %vm239_vm9, %v240_v56, %v238_v57  ;;  %v278_v4 = vmul.f32 0.0625, %v277_v63  ;;  %v179_v32 = vadd.f32 %v178_v31, %v177_v30 }
  0xfc   :  { %v258_v61 = vsub.f32 100.0, %v241_v58  ;;  %v299_v0 = vsub.f32 0.0, %v280_v11 }
  0xfd   :  { %v295_v20 = vmul.f32 %v294_v16, %v278_v4  ;;  %v180_v33 = vrot.slane %v179_v32, 2 }
  0xfe   :  { %v281_v3 = vld [vmem:[#allocation5] sm:$0xff]  ;;  %v259_v5 = vmax.f32 %v258_v61, 0.0 }
  0xff   :  { %v282_v6 = vmul.f32 0.0625, %v281_v3  ;;  %v181_v36 = vadd.f32 %v180_v33, %v179_v32 }
 0x100   :  { %v439_v9 = vpop.eup %438  ;;  %v260_v10 = vadd.f32 %v259_v5, %v257_v7 }
 0x101   :  { %v291_v12 = vmul.f32 %v439_v9, %v289_v59  ;;  %v301_v17 = vsub.f32 0.0, %v282_v6  ;;  %v182_v28 = vrot.slane %v181_v36, 1 }
 0x102   :  { %v261_v13 = vmul.f32 %v260_v10, %v260_v10 }
 0x103   :  { %v292_v18 = vsel %vm286_vm7, 0.0, %v291_v12  ;;  %v347_v24 = vmul.f32 %v317_v15, %v301_v17  ;;  %v183_v41 = vadd.f32 %v182_v28, %v181_v36 }
 0x104   :  { %v263_v19 = vsel %vm262_vm12, %v261_v13, 0.0  ;;  %v296_v21 = vmul.f32 %v292_v18, %v280_v11 }
 0x105   :  { %264 = vadd.xlane.f32.xlu1 %v263_v19  ;;  %v348_v27 = vsel %vm81_vm0, %v347_v24, 0.0 }
 0x106   :  { %v297_v23 = vsub.f32 %v295_v20, %v296_v21 }
 0x108   :  { %v300_v25 = vsel %vm298_vm13, %v299_v0, %v297_v23 }
 0x109   :  { %319 = vadd.xlane.f32.xlu1 %v318_v22  ;;  %v330_v26 = vmul.f32 %v695_v14, %v300_v25  ;;  %v308_v14 = vpop.xlane.xlu0 %307 }
 0x10a   :  { %v309_v2 = vrot.slane %v308_v14, 4 }
 0x10b   :  { %v331_v29 = vsel %vm81_vm0, %v330_v26, 0.0 }
 0x10c   :  { %332 = vadd.xlane.f32.xlu0 %v331_v29  ;;  %v310_v43 = vadd.f32 %v309_v2, %v308_v14 }
 0x10d   :  { %349 = vadd.xlane.f32.xlu1 %v348_v27 }
 0x10e   :  { %v311_v44 = vrot.slane %v310_v43, 2 }
 0x110   :  { %v312_v49 = vadd.f32 %v311_v44, %v310_v43 }
 0x112   :  { %v313_v57 = vrot.slane %v312_v49, 1 }
 0x114   :  { %v314_v5 = vadd.f32 %v313_v57, %v312_v49 }
 0x17c   :  { %v153_v34 = vpop.xlane.xlu1 %152 }
 0x17d   :  { %v154_v35 = vrot.slane %v153_v34, 4 }
 0x17f   :  { %v155_v37 = vadd.f32 %v154_v35, %v153_v34 }
 0x181   :  { %v156_v38 = vrot.slane %v155_v37, 2 }
 0x183   :  { %v157_v39 = vadd.f32 %v156_v38, %v155_v37 }
 0x185   :  { %v158_v40 = vrot.slane %v157_v39, 1 }
 0x187   :  { %v159_v42 = vadd.f32 %v158_v40, %v157_v39 }
 0x189   :  { %398 = vpush %v159_v42 }
 0x18a   :  { %400 = vpush %v183_v41 }
 0x192   :  { %v265_v45 = vpop.xlane.xlu1 %264 }
 0x193   :  { %v266_v46 = vrot.slane %v265_v45, 4 }
 0x195   :  { %v267_v47 = vadd.f32 %v266_v46, %v265_v45 }
 0x196   :  { %v320_v48 = vpop.xlane.xlu1 %319 }
 0x197   :  { %v268_v50 = vrot.slane %v267_v47, 2  ;;  %v321_v51 = vrot.slane %v320_v48, 4 }
 0x199   :  { %v322_v52 = vadd.f32 %v321_v51, %v320_v48  ;;  %v333_v53 = vpop.xlane.xlu0 %332  ;;  %v269_v54 = vadd.f32 %v268_v50, %v267_v47 }
 0x19a   :  { %v334_v55 = vrot.slane %v333_v53, 4  ;;  %v350_v56 = vpop.xlane.xlu1 %349 }
 0x19b   :  { %v323_v58 = vrot.slane %v322_v52, 2  ;;  %v351_v59 = vrot.slane %v350_v56, 4  ;;  %v270_v60 = vrot.slane %v269_v54, 1 }
 0x19c   :  { %v335_v61 = vadd.f32 %v334_v55, %v333_v53 }
 0x19d   :  { %v352_v62 = vadd.f32 %v351_v59, %v350_v56  ;;  %v271_v63 = vadd.f32 %v270_v60, %v269_v54  ;;  %v324_v1 = vadd.f32 %v323_v58, %v322_v52 }
 0x19e   :  { %v336_v3 = vrot.slane %v335_v61, 2 }
 0x19f   :  { %v353_v6 = vrot.slane %v352_v62, 2  ;;  %402 = vpush %v271_v63  ;;  %v325_v7 = vrot.slane %v324_v1, 1 }
 0x1a0   :  { %v337_v8 = vadd.f32 %v336_v3, %v335_v61  ;;  %404 = vpush %v314_v5 }
 0x1a1   :  { %v354_v9 = vadd.f32 %v353_v6, %v352_v62  ;;  %v326_v10 = vadd.f32 %v325_v7, %v324_v1 }
 0x1a2   :  { %v338_v4 = vrot.slane %v337_v8, 1 }
 0x1a3   :  { %406 = vpush %v326_v10  ;;  %v355_v11 = vrot.slane %v354_v9, 1 }
 0x1a4   :  { %v339_v12 = vadd.f32 %v338_v4, %v337_v8 }
 0x1a5   :  { %v356_v13 = vadd.f32 %v355_v11, %v354_v9 }
 0x1a6   :  { %408 = vpush %v339_v12 }
 0x1a7   :  { %410 = vpush %v356_v13 }
 0x1ba   :  { %s399_s2 = spop %398 }
 0x1bb   :  { %v161_v15 = vstv %s399_s2  ;;  %s401_s5 = spop %400 }
 0x1bc   :  { %v163_v16 = vmul.f32 0.125, %v161_v15  ;;  %v185_v17 = vstv %s401_s5 }
 0x1bd   :  { %v186_v18 = vmul.f32 0.125, %v185_v17 }
 0x1be   :  { %373 = vst [vmem:[#allocation14 + $0x1] sm:$0x1] %v163_v16 }
 0x1bf   :  { %374 = vst [vmem:[#allocation14 + $0x2] sm:$0x1] %v186_v18  ;;  %v368_v36 = vmul.f32 0.2, %v186_v18 }
 0x1d0   :  { %s403_s15 = spop %402 }
 0x1d1   :  { %v273_v19 = vstv %s403_s15  ;;  %s405_s16 = spop %404 }
 0x1d2   :  { %v275_v20 = vmul.f32 0.5, %v273_v19  ;;  %v316_v21 = vstv %s405_s16 }
 0x1d3   :  { %v342_v0 = vmax.f32 %v316_v21, 1.0  ;;  %vm329_vm14 = vcmp.gt.f32.partialorder %v316_v21, 0.0 }
 0x1d4   :  { %375 = vst [vmem:[#allocation14 + $0x3] sm:$0x1] %v275_v20  ;;  %s407_s17 = spop %406  ;;  %v366_v26 = vmul.f32 0.0005, %v275_v20 }
 0x1d5   :  { %440 = vrcp.f32 %v342_v0  ;;  %v328_v22 = vstv %s407_s17 }
 0x1d6   :  { %v359_v23 = vmax.f32 %v328_v22, 1.0  ;;  %v367_v34 = vadd.f32 %v366_v26, %v163_v16  ;;  %vm346_vm15 = vcmp.gt.f32.partialorder %v328_v22, 0.0 }
 0x1d7   :  { %s409_s0 = spop %408 }
 0x1d8   :  { %442 = vrcp.f32 %v359_v23  ;;  %v341_v25 = vstv %s409_s0  ;;  %s411_s30 = spop %410  ;;  %v369_v38 = vadd.f32 %v368_v36, %v367_v34 }
 0x1d9   :  { %v358_v31 = vstv %s411_s30 }
 0x1df   :  { %v441_v24 = vpop.eup %440 }
 0x1e0   :  { %v344_v27 = vmul.f32 %v441_v24, %v341_v25 }
 0x1e2   :  { %v443_v29 = vpop.eup %442  ;;  %v345_v30 = vsel %vm329_vm14, %v344_v27, 0.0 }
 0x1e3   :  { %v363_v32 = vmul.f32 0.5, %v345_v30  ;;  %v361_v33 = vmul.f32 %v443_v29, %v358_v31 }
 0x1e5   :  { %376 = vst [vmem:[#allocation14 + $0x4] sm:$0x1] %v363_v32  ;;  %v362_v35 = vsel %vm346_vm15, %v361_v33, 0.0 }
 0x1e6   :  { %v364_v37 = vmul.f32 0.1, %v362_v35 }
 0x1e8   :  { %v365_v28 = vadd.f32 %v364_v37, %v363_v32  ;;  %377 = vst [vmem:[#allocation14 + $0x5] sm:$0x1] %v364_v37 }
 0x1ea   :  { %v370_v39 = vadd.f32 %v369_v38, %v365_v28  ;;  %378 = vst [vmem:[#allocation14 + $0x6] sm:$0x1] %v365_v28 }
 0x1ec   :  { %372 = vst [vmem:[#allocation14] sm:$0x1] %v370_v39 }
 0x1ed   :  { %543 = shalt.err (!%p540_p8)
}
 0x1ee   :  { %s544_s23 = scalar_lea.hbm %s745_s8, 128 }
 0x1ef   :  { %p545_p9 = scmp.ne.s32.totalorder %s745_s8, %s544_s23  ;;  %p548_p10 = scmp.lt.u32.totalorder %s544_s23, %s745_s8 }
 0x1f1   :  { %p550_p11 = pnand %p548_p10, %p545_p9 }
 0x1f3   :  { %553 = shalt.err (!%p550_p11)
}
 0x1f4   :  { %388 = dma.vmem_to_hbm [thread:$0]  %s386_s19, 128, %s745_s8, [#allocation8]  }
 0x1f5   :  { %560 = dma.done.wait [#allocation8], 128  }
 0x1f6   :  { %561 = vsyncadd [#allocation8], 4294967168 }
 0x1f7   :  { %392 = vsyncpa [#allocation7], 1 }
 0x1f8   :  { %393 = vsyncpa [#allocation10], 1 }
 0x1f9   :  { %394 = vsyncpa [#allocation13], 1 }
 0x1fa   :  { %395 = vsyncpa [#allocation8], 1 }

</bundles_post_ra>
